<compile_context>
chip_gen: v6e
topology: v6e:2x2x1
jax: 0.10.0
libtpu: 0.0.40
codegen_flags: <defaults>
</compile_context>

<pallas_src>
import jax
import jax.numpy as jnp
from jax.experimental import pallas as pl
from jax.experimental.pallas import tpu as pltpu


def _round_up(x, m):
    return (x + m - 1) // m * m


def _head_kernel(x_ref, w_ref, b_ref, o_ref, acc_ref):
    """x_ref: [TB, TS, fea]; w_ref: [fea, NP] (f32, pre-scaled by 1/seq);
    b_ref: [1, NP] (f32); o_ref: [TB, NP]; acc_ref: [TB, fea] f32 scratch."""
    k = pl.program_id(1)

    @pl.when(k == 0)
    def _():
        acc_ref[...] = jnp.zeros_like(acc_ref)

    # Partial sum over this seq chunk, accumulated in f32 without
    # materializing an f32 copy of the whole block.
    acc_ref[...] += jnp.sum(x_ref[...], axis=1, dtype=jnp.float32)

    @pl.when(k == pl.num_programs(1) - 1)
    def _():
        # 1/seq already folded into w; output is lane-dense ([TB, 128*m]).
        out = jnp.dot(acc_ref[...], w_ref[...],
                      preferred_element_type=jnp.float32)
        o_ref[...] = (out + b_ref[...]).astype(o_ref.dtype)


def _choose_tiles(bs, seq, fea, itemsize, budget):
    """Pick (tb, ts) that divide (bs, seq) exactly whenever possible so the
    wrapper never has to jnp.pad (copy) x."""
    # --- batch tile ---
    if bs <= 128:
        tb = bs                              # full-extent rows: always legal, no pad
    else:
        tb = 8                               # may force padding only if bs % 8 != 0
        for cand in range(128, 7, -8):       # largest multiple-of-8 divisor <= 128
            if bs % cand == 0:
                tb = cand
                break
    # --- seq tile ---
    row_bytes = max(tb, 8) * fea * itemsize
    if seq <= 8 or seq * row_bytes <= budget:
        ts = seq                             # single full-extent seq block
    else:
        ts_cap = max(8, min(seq, budget // max(row_bytes, 1)) // 8 * 8)
        ts = 8
        for cand in range(ts_cap, 7, -8):    # largest mult-of-8 divisor of seq that fits
            if seq % cand == 0:
                ts = cand
                break
        if seq % ts:                         # no suitable divisor: keep largest tile,
            ts = ts_cap                      # wrapper pads the seq tail (rare)
    return tb, ts


def classification_head_pallas(x, weight, bias, *, tb=None, ts=None):
    """x: [bs, seq, fea]; weight: [n_classes, fea]; bias: [n_classes]."""
    bs, seq, fea = x.shape
    n_classes = weight.shape[0]
    itemsize = jnp.dtype(x.dtype).itemsize
    np_ = _round_up(n_classes, 128)          # lane-dense output width

    if tb is None or ts is None:
        # VMEM budget for the streamed x block: leave room for the resident
        # (double-buffered) weight/bias and the accumulator under the 32 MiB
        # scoped-VMEM limit requested below.
        resident = 2 * (fea * np_ + np_) * 4 + 128 * fea * 4
        budget = int(max(512 * 1024,
                         min(4 * 1024 * 1024,
                             (24 * 1024 * 1024 - resident) // 2)))
        tb_a, ts_a = _choose_tiles(bs, seq, fea, itemsize, budget)
        tb = tb_a if tb is None else tb
        ts = ts_a if ts is None else ts

    bs_p = _round_up(bs, tb)
    seq_p = _round_up(seq, ts)

    if (bs_p, seq_p) != (bs, seq):
        # Rare fallback (user-forced tiles / shapes with no suitable divisor).
        # Zero seq rows don't change the sum (the mean scale below uses the
        # TRUE seq length); padded batch rows only see the bias and are
        # sliced off below.
        x = jnp.pad(x, ((0, bs_p - bs), (0, seq_p - seq), (0, 0)))

    # Pre-transpose, fold the 1/seq mean scale into the weight, pad to 128 lanes.
    w_t = weight.T.astype(jnp.float32) * (1.0 / seq)             # [fea, n_classes]
    w_p = jnp.zeros((fea, np_), jnp.float32).at[:, :n_classes].set(w_t)
    b_p = jnp.zeros((1, np_), jnp.float32).at[0, :n_classes].set(
        bias.astype(jnp.float32))

    grid = (bs_p // tb, seq_p // ts)

    out = pl.pallas_call(
        _head_kernel,
        out_shape=jax.ShapeDtypeStruct((bs_p, np_), x.dtype),
        grid=grid,
        in_specs=[
            pl.BlockSpec((tb, ts, fea), lambda i, k: (i, k, 0)),   # streamed
            pl.BlockSpec((fea, np_), lambda i, k: (0, 0)),         # VMEM-resident
            pl.BlockSpec((1, np_), lambda i, k: (0, 0)),           # VMEM-resident
        ],
        out_specs=pl.BlockSpec((tb, np_), lambda i, k: (i, 0)),
        scratch_shapes=[pltpu.VMEM((tb, fea), jnp.float32)],
        compiler_params=pltpu.CompilerParams(
            dimension_semantics=("parallel", "arbitrary"),
            vmem_limit_bytes=32 * 1024 * 1024,
        ),
    )(x, w_p, b_p)

    return out[:bs, :n_classes]


def classification_head(x, weight, bias):
    """Dispatcher: tiny inputs go to plain XLA (per-call/grid-step overhead
    dwarfs <~1 MiB of streaming work); large inputs use the Pallas kernel."""
    bs, seq, fea = x.shape
    if bs * seq * fea * jnp.dtype(x.dtype).itemsize < (1 << 20):
        pooled = jnp.mean(x.astype(jnp.float32), axis=1)
        out = pooled @ weight.astype(jnp.float32).T + bias.astype(jnp.float32)
        return out.astype(x.dtype)
    return classification_head_pallas(x, weight, bias)


if __name__ == "__main__":
    key = jax.random.PRNGKey(0)
    k1, k2, k3, k4, k5, k6 = jax.random.split(key, 6)

    # ---- Test 1: shapes implied by the module (bs=2, num_patch=8, d_model=32, 4 classes)
    bs, seq, fea, n_classes = 2, 8, 32, 4
    x = jax.random.normal(k1, (bs, seq, fea), dtype=jnp.float32)
    bound = 1.0 / (fea ** 0.5)  # nn.Linear default init range
    weight = jax.random.uniform(k2, (n_classes, fea), jnp.float32, -bound, bound)
    bias = jax.random.uniform(k3, (n_classes,), jnp.float32, -bound, bound)

    out = jax.block_until_ready(classification_head_pallas(x, weight, bias))
    ref = jnp.mean(x, axis=1) @ weight.T + bias
    assert out.shape == (bs, n_classes)
    assert jnp.allclose(out, ref, atol=1e-5, rtol=1e-5), "test 1 mismatch"

    # Dispatcher (tiny -> plain XLA) must agree too.
    out_d = jax.block_until_ready(classification_head(x, weight, bias))
    assert jnp.allclose(out_d, ref, atol=1e-5, rtol=1e-5), "dispatch mismatch"

    # ---- Test 2: multi-block grid WITHOUT padding (tiles divide exactly)
    bs2, seq2, fea2, nc2 = 16, 24, 160, 10
    x2 = jax.random.normal(k4, (bs2, seq2, fea2), dtype=jnp.float32)
    bound2 = 1.0 / (fea2 ** 0.5)
    w2 = jax.random.uniform(k5, (nc2, fea2), jnp.float32, -bound2, bound2)
    b2 = jax.random.uniform(k6, (nc2,), jnp.float32, -bound2, bound2)

    out2 = jax.block_until_ready(
        classification_head_pallas(x2, w2, b2, tb=8, ts=8))  # grid (2, 3), no pad
    ref2 = jnp.mean(x2, axis=1) @ w2.T + b2
    assert out2.shape == (bs2, nc2)
    assert jnp.allclose(out2, ref2, atol=1e-4, rtol=1e-4), "test 2 mismatch"

    # ---- Test 3: padding fallback path (forced tiles that do not divide)
    bs3, seq3 = 10, 20
    x3 = jax.random.normal(k1, (bs3, seq3, fea2), dtype=jnp.float32)
    out3 = jax.block_until_ready(
        classification_head_pallas(x3, w2, b2, tb=8, ts=8))  # padded to (16, 24)
    ref3 = jnp.mean(x3, axis=1) @ w2.T + b2
    assert out3.shape == (bs3, nc2)
    assert jnp.allclose(out3, ref3, atol=1e-4, rtol=1e-4), "test 3 mismatch"

    print("KERNEL_OK")
</pallas_src>

<mosaic_0001>
module attributes {stable_mosaic.version = 11 : i64} {
  func.func @_head_kernel(%arg0: i32, %arg1: i32, %arg2: memref<2x8x32xf32, #tpu.memory_space<vmem>>, %arg3: memref<32x128xf32, #tpu.memory_space<vmem>>, %arg4: memref<1x128xf32, #tpu.memory_space<vmem>>, %arg5: memref<2x128xf32, #tpu.memory_space<vmem>>, %arg6: memref<2x32xf32, #tpu.memory_space<vmem>>) attributes {dimension_semantics = [#tpu.dimension_semantics<parallel>, #tpu.dimension_semantics<arbitrary>], iteration_bounds = array<i64: 1, 1>, scalar_prefetch = 0 : i64, scratch_operands = 1 : i64, tpu.core_type = #tpu.core_type<tc>, window_params = [{transform_indices = @transform_0, window_bounds = array<i64: 2, 8, 32>}, {pipeline_mode = #tpu.pipeline_mode<synchronous>, transform_indices = @transform_1, window_bounds = array<i64: 32, 128>}, {pipeline_mode = #tpu.pipeline_mode<synchronous>, transform_indices = @transform_2, window_bounds = array<i64: 1, 128>}, {transform_indices = @transform_3, window_bounds = array<i64: 2, 128>}]} {
    %c0_i32 = arith.constant 0 : i32
    %0 = arith.cmpi eq, %arg1, %c0_i32 : i32
    %1 = arith.extui %0 : i1 to i32
    %c0_i32_0 = arith.constant 0 : i32
    %2 = arith.cmpi ne, %1, %c0_i32_0 : i32
    scf.if %2 {
      %cst_9 = arith.constant 0.000000e+00 : f32
      %11 = vector.broadcast %cst_9 : f32 to vector<2x32xf32>
      %c0_10 = arith.constant 0 : index
      %c0_11 = arith.constant 0 : index
      %12 = vector.load %arg6[%c0_10, %c0_11] : memref<2x32xf32, #tpu.memory_space<vmem>>, vector<2x32xf32>
      tpu.vector_store %arg6[%c0_10, %c0_11], %11 {strides = array<i32>} : memref<2x32xf32, #tpu.memory_space<vmem>>, vector<2x32xf32>,
    } else {
    }
    %c0 = arith.constant 0 : index
    %c0_1 = arith.constant 0 : index
    %3 = vector.load %arg6[%c0, %c0_1] : memref<2x32xf32, #tpu.memory_space<vmem>>, vector<2x32xf32>
    %c0_2 = arith.constant 0 : index
    %c0_3 = arith.constant 0 : index
    %c0_4 = arith.constant 0 : index
    %4 = vector.load %arg2[%c0_2, %c0_3, %c0_4] : memref<2x8x32xf32, #tpu.memory_space<vmem>>, vector<2x8x32xf32>
    %cst = arith.constant dense<0.000000e+00> : vector<2x32xf32>
    %5 = vector.multi_reduction <add>, %4, %cst [1] : vector<2x8x32xf32> to vector<2x32xf32>
    %6 = arith.addf %3, %5 : vector<2x32xf32>
    %c0_5 = arith.constant 0 : index
    %c0_6 = arith.constant 0 : index
    %7 = vector.load %arg6[%c0_5, %c0_6] : memref<2x32xf32, #tpu.memory_space<vmem>>, vector<2x32xf32>
    tpu.vector_store %arg6[%c0_5, %c0_6], %6 {strides = array<i32>} : memref<2x32xf32, #tpu.memory_space<vmem>>, vector<2x32xf32>,
    %c0_i32_7 = arith.constant 0 : i32
    %8 = arith.cmpi eq, %arg1, %c0_i32_7 : i32
    %9 = arith.extui %8 : i1 to i32
    %c0_i32_8 = arith.constant 0 : i32
    %10 = arith.cmpi ne, %9, %c0_i32_8 : i32
    scf.if %10 {
      %c0_9 = arith.constant 0 : index
      %c0_10 = arith.constant 0 : index
      %11 = vector.load %arg6[%c0_9, %c0_10] : memref<2x32xf32, #tpu.memory_space<vmem>>, vector<2x32xf32>
      %c0_11 = arith.constant 0 : index
      %c0_12 = arith.constant 0 : index
      %12 = vector.load %arg3[%c0_11, %c0_12] : memref<32x128xf32, #tpu.memory_space<vmem>>, vector<32x128xf32>
      %cst_13 = arith.constant dense<0.000000e+00> : vector<2x128xf32>
      %13 = tpu.matmul %11, %12, %cst_13 {dimension_numbers = #tpu.dot_dimension_numbers<[1], [0], [0], [1], [0, 0, 1, 1], [], []>} : vector<2x32xf32>, vector<32x128xf32>, vector<2x128xf32> -> vector<2x128xf32>
      %c0_14 = arith.constant 0 : index
      %c0_15 = arith.constant 0 : index
      %14 = vector.load %arg4[%c0_14, %c0_15] : memref<1x128xf32, #tpu.memory_space<vmem>>, vector<1x128xf32>
      %15 = vector.broadcast %14 : vector<1x128xf32> to vector<2x128xf32>
      %16 = arith.addf %13, %15 : vector<2x128xf32>
      %c0_16 = arith.constant 0 : index
      %c0_17 = arith.constant 0 : index
      %17 = vector.load %arg5[%c0_16, %c0_17] : memref<2x128xf32, #tpu.memory_space<vmem>>, vector<2x128xf32>
      tpu.vector_store %arg5[%c0_16, %c0_17], %16 {strides = array<i32>} : memref<2x128xf32, #tpu.memory_space<vmem>>, vector<2x128xf32>,
    } else {
    }
    return
  }
  func.func @transform_0(%arg0: i32, %arg1: i32) -> (i32, i32, i32) {
    %c0_i32 = arith.constant 0 : i32
    %c0_i32_0 = arith.constant 0 : i32
    return %arg0, %arg1, %c0_i32 : i32, i32, i32
  }
  func.func @transform_1(%arg0: i32, %arg1: i32) -> (i32, i32) {
    %c0_i32 = arith.constant 0 : i32
    %c0_i32_0 = arith.constant 0 : i32
    %c0_i32_1 = arith.constant 0 : i32
    return %c0_i32, %c0_i32_0 : i32, i32
  }
  func.func @transform_2(%arg0: i32, %arg1: i32) -> (i32, i32) {
    %c0_i32 = arith.constant 0 : i32
    %c0_i32_0 = arith.constant 0 : i32
    %c0_i32_1 = arith.constant 0 : i32
    return %c0_i32, %c0_i32_0 : i32, i32
  }
  func.func @transform_3(%arg0: i32, %arg1: i32) -> (i32, i32) {
    %c0_i32 = arith.constant 0 : i32
    %c0_i32_0 = arith.constant 0 : i32
    return %arg0, %c0_i32 : i32, i32
  }
}

</mosaic_0001>

<bundles_post_ra>
// kernel: tpu_custom_call.1
= control target key start
LH: loop header
LB: loop body
LE: loop exit
PB: predicated region body
PF: predicated region fallthrough
CT: control target
= control target key end

     0   :  { %8 = vsyncpa [#allocation4], 0  ;;  %s315_s0 = inlined_call_operand.hbm [shape: f32[2,8,32], index: 0, kind: input, shape index: {}]   ;;  %s316_s1 = inlined_call_operand.hbm [shape: f32[32,128], index: 1, kind: input, shape index: {}]   ;;  %s317_s2 = inlined_call_operand.vmem [shape: f32[1,128], index: 2, kind: input, shape index: {}]   ;;  %s318_s3 = inlined_call_operand.hbm [shape: f32[2,128], index: 3, kind: output, shape index: {}]  }
   0x1   :  { %9 = vsyncpa [#allocation7], 0 }
   0x2   :  { %10 = vsyncpa [#allocation5], 0  ;;  %s271_s12 = smov [#allocation3]  }
   0x3   :  { %s16_s13 = sshll.u32 %s271_s12, 4  ;;  %s17_s13 = int_to_ptr.vmem [resolvable:$true] %s16_s13 }
   0x4   :  { %s213_s14 = scalar_lea.vmem %s17_s13, 256  ;;  %p218_p1 = scmp.lt.s32.totalorder %s17_s13, %s17_s13 }
   0x5   :  { %p214_p0 = scmp.ne.s32.totalorder %s17_s13, %s213_s14  ;;  %p219_p2 = scmp.lt.s32.totalorder %s213_s14, %s213_s14 }
   0x7   :  { %p220_p3 = por %p219_p2, %p218_p1 }
   0x9   :  { %p221_p4 = pnand %p220_p3, %p214_p0 }
   0xb   :  { %224 = shalt.err (!%p221_p4)
}
   0xc   :  { %s272_s15 = smov 128   ;;  %s273_s16 = smov 8  }
   0xd   :  { %22 = dma.hbm_to_vmem [thread:$0]  %s315_s0, 256, %s17_s13, [#allocation4], %s272_s15, %s272_s15, %s273_s16  }
   0xe   :  { %s274_s19 = smov [#allocation6]  }
   0xf   :  { %s28_s20 = sshll.u32 %s274_s19, 4  ;;  %s29_s20 = int_to_ptr.vmem [resolvable:$true] %s28_s20 }
  0x10   :  { %s233_s21 = scalar_lea.vmem %s29_s20, 512  ;;  %p238_p6 = scmp.lt.s32.totalorder %s29_s20, %s29_s20 }
  0x11   :  { %p234_p5 = scmp.ne.s32.totalorder %s29_s20, %s233_s21  ;;  %p239_p7 = scmp.lt.s32.totalorder %s233_s21, %s233_s21 }
  0x13   :  { %p240_p8 = por %p239_p7, %p238_p6 }
  0x15   :  { %p241_p9 = pnand %p240_p8, %p234_p5 }
  0x17   :  { %244 = shalt.err (!%p241_p9)
}
  0x18   :  { %34 = dma.hbm_to_vmem [thread:$0]  %s316_s1, 512, %s29_s20, [#allocation7], %s272_s15, %s272_s15, %s273_s16  }
  0x19   :  { %265 = dma.done.wait [#allocation4], 256  }
  0x1a   :  { %266 = vsyncadd [#allocation4], 4294967040 }
  0x1b   :  { %267 = dma.done.wait [#allocation7], 512  }
  0x1c   :  { %268 = vsyncadd [#allocation7], 4294966784  ;;  %vm47_vm0 = vcmask 254976   ;;  %v275_v0 = vmov 0.0   ;;  %vm276_vm1 = vmmov 0   ;;  %vm52_vm2 = vcmask 261120  }
  0x1d   :  { %48 = vst.msk [vmem:[#allocation2] sm:$0x3] %vm47_vm0, %v275_v0  ;;  %187 = vmatprep.subr.mxu0 %v275_v0  ;;  %195 = vmatprep.mubr.msk.f32.mxu0 %vm276_vm1, %v275_v0  ;;  %v82_v1 = vld [vmem:[#allocation6 + $0x18] sm:$0xff]  ;;  %v81_v2 = vld [vmem:[#allocation6 + $0x10] sm:$0xff]  ;;  %v80_v4 = vld [vmem:[#allocation6 + $0x8] sm:$0xff]  ;;  %vm69_vm3 = vcmask 1041409  }
  0x1e   :  { %188 = vmatpush3.msra.mxu0 %v82_v1  ;;  %v50_v3 = vld [vmem:[#allocation3] sm:$0xff]  ;;  %v51_v5 = vld [vmem:[#allocation3 + $0x8] sm:$0xff]  ;;  %v79_v9 = vld [vmem:[#allocation6] sm:$0xff]  ;;  %s277_s24 = smov [#allocation8]  }
  0x1f   :  { %189 = vmatprep.subr.mxu0 %v275_v0  ;;  %v53_v6 = vsel %vm52_vm2, %v50_v3, 0.0  ;;  %v60_v8 = vsel %vm52_vm2, %v51_v5, 0.0  ;;  %v180_v25 = vld [vmem:[%s317_s2] ss:$0 sm:$0xff]  ;;  %s170_s25 = sshll.u32 %s277_s24, 4  ;;  %s171_s25 = int_to_ptr.vmem [resolvable:$true] %s170_s25 }
  0x20   :  { %190 = vmatpush3.msra.mxu0 %v81_v2  ;;  %v54_v7 = vrot.slane %v53_v6, 4  ;;  %v61_v10 = vrot.slane %v60_v8, 4  ;;  %s245_s26 = scalar_lea.vmem %s171_s25, 32  ;;  %p250_p11 = scmp.lt.s32.totalorder %s171_s25, %s171_s25 }
  0x21   :  { %191 = vmatprep.subr.mxu0 %v275_v0  ;;  %p246_p10 = scmp.ne.s32.totalorder %s171_s25, %s245_s26  ;;  %p251_p12 = scmp.lt.s32.totalorder %s245_s26, %s245_s26 }
  0x22   :  { %192 = vmatpush3.msra.mxu0 %v80_v4  ;;  %v55_v11 = vadd.f32 %v54_v7, %v53_v6  ;;  %v62_v12 = vadd.f32 %v61_v10, %v60_v8 }
  0x23   :  { %193 = vmatprep.subr.mxu0 %v275_v0  ;;  %p252_p13 = por %p251_p12, %p250_p11 }
  0x24   :  { %194 = vmatpush3.msra.mxu0 %v79_v9  ;;  %v56_v13 = vrot.slane %v55_v11, 2  ;;  %v63_v14 = vrot.slane %v62_v12, 2  ;;  %v49_v20 = vld [vmem:[#allocation2] sm:$0x3] }
  0x25   :  { %p253_p0 = pnand %p252_p13, %p246_p10 }
  0x26   :  { %v57_v15 = vadd.f32 %v56_v13, %v55_v11  ;;  %v64_v16 = vadd.f32 %v63_v14, %v62_v12 }
  0x28   :  { %v58_v17 = vrot.slane %v57_v15, 1  ;;  %v65_v18 = vrot.slane %v64_v16, 1 }
  0x2a   :  { %v59_v19 = vadd.f32 %v58_v17, %v57_v15  ;;  %v66_v21 = vadd.f32 %v65_v18, %v64_v16 }
  0x2c   :  { %v70_v22 = vsel %vm69_vm3, %v66_v21, %v59_v19 }
  0x2d   :  { %v72_v23 = vadd.f32 %v70_v22, %v49_v20 }
  0x2f   :  { %74 = vst.msk [vmem:[#allocation2] sm:$0x3] %vm47_vm0, %v72_v23 }
  0x36   :  { %v78_v24 = vld [vmem:[#allocation2] sm:$0x3] }
  0x37   :  { %196 = vmatmul.mubr.msk.f32.vlgmr.msra.gmra.mxu0 %vm52_vm2, %v78_v24 }
  0xf7   :  { %v159_v26 = vpop.f32.mrf.mxu0 }
  0xf8   :  { %v160_v27 = vadd.f32 %v180_v25, %v159_v26 }
  0xf9   :  { %v197_v28 = vpop.f32.mrf.mxu0 }
  0xfa   :  { %163 = vst [vmem:[#allocation8] sm:$0x3] %v160_v27 }
  0xfb   :  { %256 = shalt.err (!%p253_p0)
}
  0xfc   :  { %173 = dma.vmem_to_hbm [thread:$0]  %s171_s25, 32, %s318_s3, [#allocation5]  }
  0xfd   :  { %269 = dma.done.wait [#allocation5], 32  }
  0xfe   :  { %270 = vsyncadd [#allocation5], 4294967264 }
  0xff   :  { %177 = vsyncpa [#allocation4], 1 }
 0x100   :  { %178 = vsyncpa [#allocation7], 1 }
 0x101   :  { %179 = vsyncpa [#allocation5], 1 }

</bundles_post_ra>
